<compile_context>
chip_gen: v7x
topology: tpu7x:2x2x1
jax: 0.10.0
libtpu: 0.0.40
codegen_flags: <defaults>
</compile_context>

<pallas_src>
import jax
import jax.numpy as jnp
from jax.experimental import pallas as pl
from jax.experimental.pallas import tpu as pltpu


# ---------------------------------------------------------------------------
# Kernel
# ---------------------------------------------------------------------------
def _control_unit_kernel(qenc_ref, cw_ref, ctrl0_ref, wpos_ref, wcq_ref, b_ref,
                         out_ref, ctrl_scratch):
    """One (batch-tile, step) grid point of the fused ControlUnit loop.

    qenc_ref    : [Bb, 2d]    question encoding (VMEM-resident across steps)
    cw_ref      : [Bb, L, d]  contextual words  (VMEM-resident across steps)
    ctrl0_ref   : [Bb, d]     initial control state (used at step 0 only)
    wpos_ref    : [2d, d]     pos_aware[step] weight, [in,out], w_attn folded in
    wcq_ref     : [d, d]      ctrl_question weight,  [in,out], w_attn folded in
    b_ref       : [1, d]      fused bias (b_pos[step] + b_cq) * w_attn
    out_ref     : [Bb, d]     control state after this step
    ctrl_scratch: [Bb, d] f32 carried control state across the step grid axis
    """
    s = pl.program_id(1)

    @pl.when(s == 0)
    def _():
        ctrl_scratch[...] = ctrl0_ref[...].astype(jnp.float32)

    cw = cw_ref[...]                                    # native dtype, resident

    # qw = (pos_aware[s](qenc) + ctrl_question(ctrl)) * w_attn
    # (w_attn already folded into the weights/bias -> no extra multiply)
    qw = (jnp.dot(qenc_ref[...], wpos_ref[...],
                  preferred_element_type=jnp.float32)
          + jnp.dot(ctrl_scratch[...], wcq_ref[...],
                    preferred_element_type=jnp.float32)
          + b_ref[...].astype(jnp.float32))             # [Bb, d] f32

    # Attention scores over the sequence axis; the [Bb, L, d] temporary stays
    # in the input dtype (no blanket f32 promotion of the dominant tensor).
    qw_c = qw.astype(cw.dtype)
    cai = jnp.sum(cw * qw_c[:, None, :], axis=-1).astype(jnp.float32)  # [Bb, L]

    # Numerically-stable softmax on the lane-dense [Bb, L] score,
    # normalized after the L-reduction (flash-attention style).
    m = jnp.max(cai, axis=-1, keepdims=True)            # [Bb, 1]
    e = jnp.exp(cai - m)                                 # [Bb, L] f32 (EUP)
    denom = jnp.sum(e, axis=-1, keepdims=True)           # [Bb, 1]
    e_c = e.astype(cw.dtype)
    num = jnp.sum(cw * e_c[:, :, None], axis=1).astype(jnp.float32)    # [Bb, d]

    next_ctrl = num / denom                               # exact normalization
    ctrl_scratch[...] = next_ctrl                         # carry to next step
    out_ref[...] = next_ctrl.astype(out_ref.dtype)


# ---------------------------------------------------------------------------
# One-time parameter preparation
# ---------------------------------------------------------------------------
def fuse_params(params):
    """Stack/transpose weights once and fold the attention weight in."""
    w_pos = params["w_pos"]                              # [S, d, 2d] torch [out,in]
    b_pos = params["b_pos"]                              # [S, d]
    w_cq = params["w_cq"]                                # [d, d]
    b_cq = params["b_cq"]                                # [d]
    w_attn = params["w_attn"][0]                         # [d] (torch Linear(d,1).weight is [1,d])
    s, d, _ = w_pos.shape

    w_pos_f = jnp.transpose(w_pos, (0, 2, 1)) * w_attn[None, None, :]   # [S, 2d, d]
    w_cq_f = jnp.transpose(w_cq) * w_attn[None, :]                       # [d, d]
    b_f = ((b_pos + b_cq[None, :]) * w_attn[None, :]).reshape(s, 1, d)   # [S, 1, d]
    return {"w_pos": w_pos_f, "w_cq": w_cq_f, "b": b_f}


# ---------------------------------------------------------------------------
# Tiling helpers
# ---------------------------------------------------------------------------
def _vmem_budget_bytes():
    phys = 64 * 1024 * 1024                              # conservative (v7x)
    try:
        phys = int(pltpu.get_tpu_info().vmem_capacity_bytes)
    except Exception:
        pass
    return min(3 * phys // 4, 100 * 1024 * 1024)         # 48 MiB v7x, 96 MiB v5e/v6e


def _choose_batch_block(B, L, d, itemsize, vmem_budget):
    """Largest sublane-aligned batch tile that fits the VMEM budget
    (double-buffered inputs/outputs + f32 carry scratch), while keeping
    >= 2 batch tiles when the batch allows it (v7x dual TensorCores)."""
    per_row = itemsize * (2 * L * d + 2 * 2 * d + 2 * d + 2 * d) + 4 * d
    fit = max(8, (int(vmem_budget * 0.8) // max(per_row, 1)) // 8 * 8)
    blk = min(B, fit)
    if B >= 16:                                           # >= 2 tiles for megacore
        half = max(8, ((B + 1) // 2 + 7) // 8 * 8)
        blk = min(blk, half)
    if blk < B:
        blk = max(8, (blk // 8) * 8)                      # tiled => multiple of 8
    else:
        blk = B                                            # full batch => always legal
    return blk


# ---------------------------------------------------------------------------
# Wrappers
# ---------------------------------------------------------------------------
def control_unit_forward_all_steps(contextual_words, question_encoding,
                                   ctrl_state, fused):
    """Run the whole MAC control chain (steps 0..S-1) in one pallas_call.

    Returns [S, B, d]: out[s] is the control state after step s, starting the
    chain from `ctrl_state` (i.e. exactly what the original per-step module
    produces when fed the previous step's output).
    """
    B, L, d = contextual_words.shape
    S = fused["w_pos"].shape[0]
    dtype = contextual_words.dtype
    itemsize = jnp.dtype(dtype).itemsize

    vmem_budget = _vmem_budget_bytes()
    B_blk = _choose_batch_block(B, L, d, itemsize, vmem_budget)
    grid = (pl.cdiv(B, B_blk), S)

    in_specs = [
        pl.BlockSpec((B_blk, 2 * d), lambda b, s: (b, 0)),        # qenc   (step-resident)
        pl.BlockSpec((B_blk, L, d), lambda b, s: (b, 0, 0)),      # cw     (step-resident)
        pl.BlockSpec((B_blk, d), lambda b, s: (b, 0)),            # ctrl0  (step-resident)
        pl.BlockSpec((None, 2 * d, d), lambda b, s: (s, 0, 0)),   # w_pos_fused[s]
        pl.BlockSpec((d, d), lambda b, s: (0, 0)),                # w_cq_fused (resident)
        pl.BlockSpec((None, 1, d), lambda b, s: (s, 0, 0)),       # b_fused[s]
    ]
    out_specs = pl.BlockSpec((None, B_blk, d), lambda b, s: (s, b, 0))

    cost = pl.CostEstimate(
        flops=S * (2 * B * 3 * d * d + 4 * B * L * d),
        transcendentals=S * B * L,
        bytes_accessed=(itemsize * (B * L * d + B * 2 * d + B * d + S * B * d)
                        + 4 * (S * (2 * d + 1) * d + d * d)),
    )

    return pl.pallas_call(
        _control_unit_kernel,
        out_shape=jax.ShapeDtypeStruct((S, B, d), dtype),
        grid=grid,
        in_specs=in_specs,
        out_specs=out_specs,
        scratch_shapes=[pltpu.VMEM((B_blk, d), jnp.float32)],
        compiler_params=pltpu.CompilerParams(
            dimension_semantics=("parallel", "arbitrary"),
            vmem_limit_bytes=int(vmem_budget)),
        cost_estimate=cost,
    )(question_encoding, contextual_words, ctrl_state,
      fused["w_pos"], fused["w_cq"], fused["b"])


def control_unit_forward(step, contextual_words, question_encoding, ctrl_state,
                         fused):
    """Original single-step module contract: one step with the given ctrl_state."""
    fused_one = {
        "w_pos": jax.lax.dynamic_slice_in_dim(fused["w_pos"], step, 1, axis=0),
        "w_cq": fused["w_cq"],
        "b": jax.lax.dynamic_slice_in_dim(fused["b"], step, 1, axis=0),
    }
    out = control_unit_forward_all_steps(contextual_words, question_encoding,
                                         ctrl_state, fused_one)
    return out[0]


# ---------------------------------------------------------------------------
# Pure-JAX references (mirror the PyTorch forward exactly)
# ---------------------------------------------------------------------------
def control_unit_reference(step, contextual_words, question_encoding,
                           ctrl_state, params):
    w_pos = params["w_pos"][step]
    b_pos = params["b_pos"][step]
    pos_aware = question_encoding @ w_pos.T + b_pos
    cqi = ctrl_state @ params["w_cq"].T + params["b_cq"] + pos_aware
    context_ctrl = cqi[:, None, :] * contextual_words
    cai = context_ctrl @ params["w_attn"].T              # [B, L, 1]
    cvi = jax.nn.softmax(cai, axis=1)
    return jnp.sum(cvi * contextual_words, axis=1)


def control_unit_reference_all_steps(contextual_words, question_encoding,
                                     ctrl_state, params):
    outs = []
    ctrl = ctrl_state
    for s in range(params["w_pos"].shape[0]):
        ctrl = control_unit_reference(s, contextual_words, question_encoding,
                                      ctrl, params)
        outs.append(ctrl)
    return jnp.stack(outs, axis=0)


def init_params(key, dim, max_step):
    """Deterministic synthetic parameters matching the torch module shapes."""
    ks = jax.random.split(key, 5)
    scale = 0.1
    return {
        # pos_aware_layers: max_step x Linear(2*dim, dim, bias=True)
        "w_pos": scale * jax.random.normal(ks[0], (max_step, dim, 2 * dim),
                                           jnp.float32),
        "b_pos": scale * jax.random.normal(ks[1], (max_step, dim), jnp.float32),
        # ctrl_question: Linear(dim, dim, bias=True)
        "w_cq": scale * jax.random.normal(ks[2], (dim, dim), jnp.float32),
        "b_cq": scale * jax.random.normal(ks[3], (dim,), jnp.float32),
        # attn: Linear(dim, 1, bias=False)
        "w_attn": scale * jax.random.normal(ks[4], (1, dim), jnp.float32),
    }


if __name__ == "__main__":
    key = jax.random.PRNGKey(0)
    k_p, k_cw, k_q, k_c = jax.random.split(key, 4)

    B, L, dim, max_step = 2, 8, 32, 4

    params = init_params(k_p, dim, max_step)
    fused = fuse_params(params)                          # one-time prep
    contextual_words = jax.random.normal(k_cw, (B, L, dim), jnp.float32)
    question_encoding = jax.random.normal(k_q, (B, 2 * dim), jnp.float32)
    ctrl_state = jax.random.normal(k_c, (B, dim), jnp.float32)

    # Fused all-steps kernel (contextual_words stays VMEM-resident across steps).
    out_all = control_unit_forward_all_steps(contextual_words, question_encoding,
                                             ctrl_state, fused)
    out_all = jax.block_until_ready(out_all)
    ref_all = control_unit_reference_all_steps(contextual_words,
                                               question_encoding, ctrl_state,
                                               params)
    assert out_all.shape == (max_step, B, dim)
    assert jnp.allclose(out_all, ref_all, atol=1e-4, rtol=1e-4), (
        f"max abs diff {jnp.max(jnp.abs(out_all - ref_all))}")

    # Original single-step contract (step=1 with an arbitrary ctrl_state).
    out1 = control_unit_forward(1, contextual_words, question_encoding,
                                ctrl_state, fused)
    out1 = jax.block_until_ready(out1)
    ref1 = control_unit_reference(1, contextual_words, question_encoding,
                                  ctrl_state, params)
    assert out1.shape == (B, dim)
    assert jnp.allclose(out1, ref1, atol=1e-4, rtol=1e-4), (
        f"max abs diff {jnp.max(jnp.abs(out1 - ref1))}")

    print("KERNEL_OK")
</pallas_src>

<mosaic_0001>
module attributes {stable_mosaic.version = 11 : i64} {
  func.func @_control_unit_kernel(%arg0: i32, %arg1: i32, %arg2: memref<2x64xf32, #tpu.memory_space<vmem>>, %arg3: memref<2x8x32xf32, #tpu.memory_space<vmem>>, %arg4: memref<2x32xf32, #tpu.memory_space<vmem>>, %arg5: memref<1x64x32xf32, #tpu.memory_space<vmem>>, %arg6: memref<32x32xf32, #tpu.memory_space<vmem>>, %arg7: memref<1x1x32xf32, #tpu.memory_space<vmem>>, %arg8: memref<1x2x32xf32, #tpu.memory_space<vmem>>, %arg9: memref<2x32xf32, #tpu.memory_space<vmem>>) attributes {dimension_semantics = [#tpu.dimension_semantics<parallel>, #tpu.dimension_semantics<arbitrary>], iteration_bounds = array<i64: 1, 4>, scalar_prefetch = 0 : i64, scratch_operands = 1 : i64, tpu.core_type = #tpu.core_type<tc>, window_params = [{transform_indices = @transform_0, window_bounds = array<i64: 2, 64>}, {transform_indices = @transform_1, window_bounds = array<i64: 2, 8, 32>}, {transform_indices = @transform_2, window_bounds = array<i64: 2, 32>}, {transform_indices = @transform_3, window_bounds = array<i64: 1, 64, 32>}, {pipeline_mode = #tpu.pipeline_mode<synchronous>, transform_indices = @transform_4, window_bounds = array<i64: 32, 32>}, {transform_indices = @transform_5, window_bounds = array<i64: 1, 1, 32>}, {transform_indices = @transform_6, window_bounds = array<i64: 1, 2, 32>}]} {
    %c0_i32 = arith.constant 0 : i32
    %0 = arith.cmpi eq, %arg1, %c0_i32 : i32
    %1 = arith.extui %0 : i1 to i32
    %c0_i32_0 = arith.constant 0 : i32
    %2 = arith.cmpi ne, %1, %c0_i32_0 : i32
    scf.if %2 {
      %c0_25 = arith.constant 0 : index
      %c0_26 = arith.constant 0 : index
      %37 = vector.load %arg4[%c0_25, %c0_26] : memref<2x32xf32, #tpu.memory_space<vmem>>, vector<2x32xf32>
      %c0_27 = arith.constant 0 : index
      %c0_28 = arith.constant 0 : index
      %38 = vector.load %arg9[%c0_27, %c0_28] : memref<2x32xf32, #tpu.memory_space<vmem>>, vector<2x32xf32>
      tpu.vector_store %arg9[%c0_27, %c0_28], %37 {strides = array<i32>} : memref<2x32xf32, #tpu.memory_space<vmem>>, vector<2x32xf32>,
    } else {
    }
    %c0 = arith.constant 0 : index
    %c0_1 = arith.constant 0 : index
    %c0_2 = arith.constant 0 : index
    %3 = vector.load %arg3[%c0, %c0_1, %c0_2] : memref<2x8x32xf32, #tpu.memory_space<vmem>>, vector<2x8x32xf32>
    %c0_3 = arith.constant 0 : index
    %c0_4 = arith.constant 0 : index
    %4 = vector.load %arg2[%c0_3, %c0_4] : memref<2x64xf32, #tpu.memory_space<vmem>>, vector<2x64xf32>
    %c0_5 = arith.constant 0 : index
    %c0_6 = arith.constant 0 : index
    %c0_7 = arith.constant 0 : index
    %5 = vector.load %arg5[%c0_5, %c0_6, %c0_7] : memref<1x64x32xf32, #tpu.memory_space<vmem>>, vector<1x64x32xf32>
    %6 = vector.shape_cast %5 : vector<1x64x32xf32> to vector<64x32xf32>
    %cst = arith.constant dense<0.000000e+00> : vector<2x32xf32>
    %7 = tpu.matmul %4, %6, %cst {dimension_numbers = #tpu.dot_dimension_numbers<[1], [0], [0], [1], [0, 0, 1, 1], [], []>} : vector<2x64xf32>, vector<64x32xf32>, vector<2x32xf32> -> vector<2x32xf32>
    %c0_8 = arith.constant 0 : index
    %c0_9 = arith.constant 0 : index
    %8 = vector.load %arg9[%c0_8, %c0_9] : memref<2x32xf32, #tpu.memory_space<vmem>>, vector<2x32xf32>
    %c0_10 = arith.constant 0 : index
    %c0_11 = arith.constant 0 : index
    %9 = vector.load %arg6[%c0_10, %c0_11] : memref<32x32xf32, #tpu.memory_space<vmem>>, vector<32x32xf32>
    %cst_12 = arith.constant dense<0.000000e+00> : vector<2x32xf32>
    %10 = tpu.matmul %8, %9, %cst_12 {dimension_numbers = #tpu.dot_dimension_numbers<[1], [0], [0], [1], [0, 0, 1, 1], [], []>} : vector<2x32xf32>, vector<32x32xf32>, vector<2x32xf32> -> vector<2x32xf32>
    %11 = arith.addf %7, %10 : vector<2x32xf32>
    %c0_13 = arith.constant 0 : index
    %c0_14 = arith.constant 0 : index
    %c0_15 = arith.constant 0 : index
    %12 = vector.load %arg7[%c0_13, %c0_14, %c0_15] : memref<1x1x32xf32, #tpu.memory_space<vmem>>, vector<1x1x32xf32>
    %13 = vector.shape_cast %12 : vector<1x1x32xf32> to vector<1x32xf32>
    %14 = vector.broadcast %13 : vector<1x32xf32> to vector<2x32xf32>
    %15 = arith.addf %11, %14 : vector<2x32xf32>
    %16 = vector.shape_cast %15 : vector<2x32xf32> to vector<2x1x32xf32>
    %17 = vector.broadcast %16 : vector<2x1x32xf32> to vector<2x8x32xf32>
    %18 = arith.mulf %3, %17 : vector<2x8x32xf32>
    %cst_16 = arith.constant dense<0.000000e+00> : vector<2x8xf32>
    %19 = vector.multi_reduction <add>, %18, %cst_16 [2] : vector<2x8x32xf32> to vector<2x8xf32>
    %cst_17 = arith.constant dense<0xFF800000> : vector<2xf32>
    %20 = vector.multi_reduction <maximumf>, %19, %cst_17 [1] : vector<2x8xf32> to vector<2xf32>
    %21 = vector.shape_cast %20 : vector<2xf32> to vector<2x1xf32>
    %22 = vector.broadcast %21 : vector<2x1xf32> to vector<2x8xf32>
    %23 = arith.subf %19, %22 : vector<2x8xf32>
    %24 = math.exp %23 : vector<2x8xf32>
    %cst_18 = arith.constant dense<0.000000e+00> : vector<2xf32>
    %25 = vector.multi_reduction <add>, %24, %cst_18 [1] : vector<2x8xf32> to vector<2xf32>
    %26 = vector.shape_cast %25 : vector<2xf32> to vector<2x1xf32>
    %27 = vector.shape_cast %24 : vector<2x8xf32> to vector<2x8x1xf32>
    %28 = vector.broadcast %27 : vector<2x8x1xf32> to vector<2x8x32xf32>
    %29 = arith.mulf %3, %28 : vector<2x8x32xf32>
    %cst_19 = arith.constant dense<0.000000e+00> : vector<2x32xf32>
    %30 = vector.multi_reduction <add>, %29, %cst_19 [1] : vector<2x8x32xf32> to vector<2x32xf32>
    %31 = vector.broadcast %26 : vector<2x1xf32> to vector<2x32xf32>
    %32 = arith.divf %30, %31 : vector<2x32xf32>
    %c0_20 = arith.constant 0 : index
    %c0_21 = arith.constant 0 : index
    %33 = vector.load %arg9[%c0_20, %c0_21] : memref<2x32xf32, #tpu.memory_space<vmem>>, vector<2x32xf32>
    tpu.vector_store %arg9[%c0_20, %c0_21], %32 {strides = array<i32>} : memref<2x32xf32, #tpu.memory_space<vmem>>, vector<2x32xf32>,
    %c0_22 = arith.constant 0 : index
    %c0_23 = arith.constant 0 : index
    %c0_24 = arith.constant 0 : index
    %34 = vector.load %arg8[%c0_22, %c0_23, %c0_24] : memref<1x2x32xf32, #tpu.memory_space<vmem>>, vector<1x2x32xf32>
    %35 = vector.shape_cast %34 : vector<1x2x32xf32> to vector<2x32xf32>
    %36 = vector.shape_cast %32 : vector<2x32xf32> to vector<1x2x32xf32>
    tpu.vector_store %arg8[%c0_22, %c0_23, %c0_24], %36 {strides = array<i32>} : memref<1x2x32xf32, #tpu.memory_space<vmem>>, vector<1x2x32xf32>,
    return
  }
  func.func @transform_0(%arg0: i32, %arg1: i32) -> (i32, i32) {
    %c0_i32 = arith.constant 0 : i32
    %c0_i32_0 = arith.constant 0 : i32
    return %arg0, %c0_i32 : i32, i32
  }
  func.func @transform_1(%arg0: i32, %arg1: i32) -> (i32, i32, i32) {
    %c0_i32 = arith.constant 0 : i32
    %c0_i32_0 = arith.constant 0 : i32
    %c0_i32_1 = arith.constant 0 : i32
    return %arg0, %c0_i32, %c0_i32_0 : i32, i32, i32
  }
  func.func @transform_2(%arg0: i32, %arg1: i32) -> (i32, i32) {
    %c0_i32 = arith.constant 0 : i32
    %c0_i32_0 = arith.constant 0 : i32
    return %arg0, %c0_i32 : i32, i32
  }
  func.func @transform_3(%arg0: i32, %arg1: i32) -> (i32, i32, i32) {
    %c0_i32 = arith.constant 0 : i32
    %c0_i32_0 = arith.constant 0 : i32
    %c0_i32_1 = arith.constant 0 : i32
    return %arg1, %c0_i32, %c0_i32_0 : i32, i32, i32
  }
  func.func @transform_4(%arg0: i32, %arg1: i32) -> (i32, i32) {
    %c0_i32 = arith.constant 0 : i32
    %c0_i32_0 = arith.constant 0 : i32
    %c0_i32_1 = arith.constant 0 : i32
    return %c0_i32, %c0_i32_0 : i32, i32
  }
  func.func @transform_5(%arg0: i32, %arg1: i32) -> (i32, i32, i32) {
    %c0_i32 = arith.constant 0 : i32
    %c0_i32_0 = arith.constant 0 : i32
    %c0_i32_1 = arith.constant 0 : i32
    return %arg1, %c0_i32, %c0_i32_0 : i32, i32, i32
  }
  func.func @transform_6(%arg0: i32, %arg1: i32) -> (i32, i32, i32) {
    %c0_i32 = arith.constant 0 : i32
    %c0_i32_0 = arith.constant 0 : i32
    return %arg1, %arg0, %c0_i32 : i32, i32, i32
  }
}

</mosaic_0001>

<bundles_post_ra>
// kernel: tpu_custom_call.1
= control target key start
LH: loop header
LB: loop body
LE: loop exit
PB: predicated region body
PF: predicated region fallthrough
CT: control target
= control target key end

     0   :  { %11 = vsyncpa [#allocation4], 0  ;;  %s1235_s0 = inlined_call_operand.vmem [shape: f32[2,64], index: 0, kind: input, shape index: {}]   ;;  %s1236_s1 = inlined_call_operand.vmem [shape: f32[2,8,32], index: 1, kind: input, shape index: {}]   ;;  %s1237_s2 = inlined_call_operand.vmem [shape: f32[2,32], index: 2, kind: input, shape index: {}]   ;;  %s1238_s3 = inlined_call_operand.vmem [shape: f32[4,64,32], index: 3, kind: input, shape index: {}]   ;;  %s1239_s4 = inlined_call_operand.vmem [shape: f32[32,32], index: 4, kind: input, shape index: {}]   ;;  %s1240_s5 = inlined_call_operand.vmem [shape: f32[4,1,32], index: 5, kind: input, shape index: {}]   ;;  %s1241_s6 = inlined_call_operand.hbm [shape: f32[4,2,32], index: 6, kind: output, shape index: {}]  }
   0x1   :  { %13 = vsyncpa [#allocation4 + $0x1], 0  ;;  %s1055_s21 = smov 0   ;;  %s1057_s22 = smov 0  }
   0x2   :  { %s1059_s23 = smov 0   ;;  %s1061_s24 = smov 0  }
   0x3   :  { %s1063_s25 = smov 0   ;;  %s1065_s26 = smov 0  }
   0x4 LB: > { %s782_s27 = sadd.s32 4294967295, %s1012_s26   ;;  %s783_s28 = sadd.s32 4294967294, %s1012_s26   ;;  %s1012_s26 = sphi %s1065_s26, %s19_s26   ;;  %s1008_s25 = sphi %s1063_s25, %s1248_s25   ;;  %s1004_s24 = sphi %s1061_s24, %s1247_s24   ;;  %s1000_s23 = sphi %s1059_s23, %s1246_s23   ;;  %s996_s22 = sphi %s1057_s22, %s1245_s22   ;;  %s992_s21 = sphi %s1055_s21, %s1244_s21  }
   0x5   : > { %s28_s29 = sadd.s32 1, %s1008_s25  ;;  %s191_s30 = sadd.s32 1, %s1000_s23 }
   0x6   : > { %p29_p0 = scmp.ge.s32.totalorder %s28_s29, 4  ;;  %p201_p1 = scmp.ne.s32.totalorder %s1000_s23, %s996_s22 }
   0x7   : > { %p202_p2 = scmp.eq.s32.totalorder %s782_s27, 3  ;;  %p207_p3 = scmp.ne.s32.totalorder %s996_s22, %s992_s21 }
   0x8   : > { %s1250_s29 = smov (%p29_p0, %s28_s29), 0  ;;  %p208_p5 = scmp.eq.s32.totalorder %s783_s28, 3 }
   0x9   : > { %p1095_p4 = por %p202_p2, %p201_p1  ;;  %s186_s8 = ssub.s32 %s1008_s25, %s1250_s29 }
   0xa   : > { %p789_p6 = scmp.ge.s32.totalorder %s1012_s26, 1  ;;  %p189_p7 = scmp.eq.s32.totalorder %s186_s8, 0 }
   0xb   : > { %p1102_p8 = por %p208_p5, %p207_p3  ;;  %p266_p9 = scmp.lt.s32.totalorder %s1012_s26, 5 }
   0xc   : > { %s1108_s10 = scalar_select %p189_p7, %s1000_s23, %s191_s30  }
   0xd   : > { %p267_p10 = pnand %p789_p6, %p266_p9 }
   0xe   : > { %s309_s11 = sand.u32 (!%p267_p10), 1, %s996_s22   ;;  %p326_p11 = scmp.lt.s32.totalorder (!%p267_p10), %s1004_s24, 3 }
   0xf   : > { %270 = sbr.rel (%p267_p10) target bundleno = 889 (0x379), region = 44  ;;  %s1114_s12 = sshll.u32 (!%p267_p10), %s309_s11, 1 }
  0x10   : > { %s311_s27 = scalar_lea.vmem (!%p267_p10), [#allocation3], %s1114_s12  ;;  %p793_p12 = scmp.ne.s32.totalorder (!%p267_p10), %s1004_s24, 0 }
  0x16   : > { %s1117_s13 = scalar_select %p326_p11, %s1004_s24, 3 }
  0x17   : > { %337 = sbr.rel (%p793_p12) target bundleno = 30 (0x1e), region = 48  ;;  %v338_v0 = vld [vmem:[%s1237_s2] sm:$0x3] (!%p793_p12)  ;;  %vm339_vm0 = vcmask (!%p793_p12), 254976  }
  0x18   : > { %s801_s14 = sshll.u32 %s1117_s13, 6  ;;  %s333_s17 = scalar_lea.vmem %s1240_s5, %s1117_s13  ;;  %340 = vst.msk [vmem:[#allocation2] sm:$0x3] (!%p793_p12), %vm339_vm0, %v338_v0 }
  0x19   : > { %s1127_s20 = scalar_lea.vmem %s1238_s3, %s801_s14 }
  0x1e PF: > { %v344_v1 = vld [vmem:[%s1127_s20] sm:$0xff]  ;;  %v345_v2 = vld [vmem:[%s1127_s20 + $0x8] sm:$0xff]  ;;  %v346_v3 = vld [vmem:[%s1127_s20 + $0x10] sm:$0xff]  ;;  %v1014_v4 = vmov 0.0|0.0   ;;  %vm1015_vm1 = vmmov 0   ;;  %v1016_v11 = vmov 0.0   ;;  %v517_v26 = vlaneseq }
  0x1f   : > { %852 = vmatprep.subr.bf16.mxu1 %v1014_v4  ;;  %v853_v5 = vpack.c.bf16 %v345_v2, %v344_v1  ;;  %v347_v6 = vld [vmem:[%s1127_s20 + $0x18] sm:$0xff]  ;;  %846 = vmatprep.subr.bf16.mxu0 %v1014_v4  ;;  %v353_v7 = vld [vmem:[%s1239_s4] sm:$0xff]  ;;  %v354_v8 = vld [vmem:[%s1239_s4 + $0x8] sm:$0xff]  ;;  %vm357_vm2 = vcmask 261120   ;;  %vm431_vm3 = vcmask 523264   ;;  %vm566_vm4 = vcmask 1041409  }
  0x20   : > { %v847_v9 = vpack.c.bf16 %v354_v8, %v353_v7  ;;  %v355_v10 = vld [vmem:[%s1239_s4 + $0x10] sm:$0xff]  ;;  %824 = vmatprep.mubr.msk.f32.mxu0 %vm1015_vm1, %v1016_v11  ;;  %843 = vmatprep.mubr.msk.f32.mxu1 %vm1015_vm1, %v1016_v11  ;;  %v856_v12 = vpack.c.bf16 %v347_v6, %v346_v3  ;;  %v356_v13 = vld [vmem:[%s1239_s4 + $0x18] sm:$0xff]  ;;  %v348_v14 = vld [vmem:[%s1127_s20 + $0x20] sm:$0xff]  ;;  %v1017_v24 = vmov 1966171168   ;;  %v518_v29 = vshrl.u32 %v517_v26, 7 }
  0x21   : > { %854 = vmatpush3.bf16.msra.mxu1 %v853_v5  ;;  %v349_v15 = vld [vmem:[%s1127_s20 + $0x28] sm:$0xff]  ;;  %v850_v16 = vpack.c.bf16 %v356_v13, %v355_v10  ;;  %v350_v18 = vld [vmem:[%s1127_s20 + $0x30] sm:$0xff]  ;;  %v351_v19 = vld [vmem:[%s1127_s20 + $0x38] sm:$0xff]  ;;  %v515_v25 = vunpack.c.l.s4 %v1017_v24  ;;  %v557_v49 = vand.u32 127, %v517_v26  ;;  %vm569_vm5 = vcmask 58368   ;;  %s798_s13 = sshll.u32 %s1004_s24, 5 }
  0x22   : > { %855 = vmatprep.subr.bf16.mxu1 %v1014_v4  ;;  %848 = vmatpush3.bf16.msra.mxu0 %v847_v9  ;;  %v859_v17 = vpack.c.bf16 %v349_v15, %v348_v14  ;;  %v352_v20 = vld [vmem:[#allocation2] sm:$0x3]  ;;  %v862_v21 = vpack.c.bf16 %v351_v19, %v350_v18  ;;  %v538_v37 = vsub.s32 0, %v518_v29  ;;  %v342_v43 = vld [vmem:[%s1236_s1 + $0x8] sm:$0xff]  ;;  %v1018_v57 = vmov 0   ;;  %s1183_s14 = scalar_lea.hbm %s1241_s6, %s798_s13  ;;  %s646_s24 = scalar_lea.sflag [#allocation4], %s309_s11 }
  0x23   : > { %849 = vmatprep.subr.bf16.mxu0 %v1014_v4  ;;  %v343_v22 = vld [vmem:[%s1235_s0] sm:$0x3]  ;;  %v516_v28 = vunpack.c.0.s8 %v515_v25  ;;  %v560_v51 = vsub.s32 %v557_v49, %v518_v29  ;;  %925 = vset.pattern.permute.xlu0 %v1018_v57  ;;  %v580_v58 = vsub.s32 1, %v518_v29  ;;  %vm642_vm6 = vcmask 254976   ;;  %s1019_s15 = smov [#allocation3]  }
  0x24   : > { %v796_v31 = vld [vmem:[%s333_s17] ss:$0 sm:$0xff]  ;;  %924 = vset.pattern.permute.xlu1 %v1018_v57  ;;  %s660_s17 = sshll.u32 %s311_s27, 4  ;;  %s938_s16 = sshll.u32 %s1019_s15, 4  ;;  %s1185_s17 = int_to_ptr.vmem [resolvable:$true] %s660_s17  ;;  %s939_s16 = int_to_ptr.vmem [resolvable:$false] %s938_s16 }
  0x25   : > { %857 = vmatpush3.bf16.msra.mxu1 %v856_v12  ;;  %v519_v33 = vsub.s32 %v516_v28, %v518_v29  ;;  %v341_v40 = vld [vmem:[%s1236_s1] sm:$0xff]  ;;  %s934_s20 = scalar_lea.vmem %s1185_s17, 32  ;;  %s940_s18 = scalar_lea.vmem %s939_s16, 64 }
  0x26   : > { %858 = vmatprep.subr.bf16.mxu1 %v1014_v4  ;;  %851 = vmatpush3.bf16.msra.mxu0 %v850_v16  ;;  %p935_p13 = scmp.ne.s32.totalorder %s1185_s17, %s934_s20  ;;  %p941_p2 = scmp.lt.s32.totalorder %s1185_s17, %s939_s16 }
  0x27   : > { %p942_p3 = scmp.lt.s32.totalorder %s940_s18, %s934_s20 }
  0x28   : > { %p936_p0 = pnand %p935_p13, %p1095_p4 }
  0x29   : > { %860 = vmatpush3.bf16.msra.mxu1 %v859_v17  ;;  %825 = vmatmul.mubr.msk.f32.vlgmr.msra.gmra.mrb[0].mxu0 %vm357_vm2, %v352_v20  ;;  %p943_p5 = por %p942_p3, %p941_p2 }
  0x2a   : > { %861 = vmatprep.subr.bf16.mxu1 %v1014_v4  ;;  %p937_p1 = pneg %p936_p0 }
  0x2c   : > { %p944_p6 = pnand %p943_p5, %p937_p1 }
  0x2d   : > { %863 = vmatpush3.bf16.msra.mxu1 %v862_v21 }
  0x30   : > { %844 = vmatmul.mubr.msk.f32.vlgmr.msra.gmra.mrb[0].mxu1 %vm431_vm3, %v343_v22 }
  0xfc   : > { %v427_v23 = vpop.f32.mrb[0].mxu0 }
  0xfd   : > { %v826_v27 = vpop.f32.mrb[1].mxu0 }
 0x103   : > { %v501_v30 = vpop.f32.mrb[0].mxu1 }
 0x104   : > { %v502_v32 = vadd.f32 %v501_v30, %v427_v23  ;;  %v845_v34 = vpop.f32.mrb[1].mxu1 }
 0x106   : > { %v512_v35 = vadd.f32 %v796_v31, %v502_v32 }
 0x108   : > { %v520_v36 = vrot.slane %v512_v35, %v519_v33 }
 0x10a   : > { %v521_v38 = vcombine.high %v520_v36, %v520_v36  ;;  %v528_v39 = vrot.slane %v520_v36, %v519_v33 }
 0x10c   : > { %v539_v41 = vrot.slane %v528_v39, %v538_v37  ;;  %v535_v42 = vrot.slane %v521_v38, %v519_v33 }
 0x10e   : > { %v546_v44 = vmul.f32 %v539_v41, %v341_v40  ;;  %v543_v45 = vrot.slane %v535_v42, %v538_v37 }
 0x110   : > { %v548_v46 = vsel %vm357_vm2, %v546_v44, 0.0  ;;  %v547_v47 = vmul.f32 %v543_v45, %v342_v43 }
 0x111   : > { %549 = vadd.xlane.f32.xlu0 %v548_v46 }
 0x112   : > { %v551_v48 = vsel %vm357_vm2, %v547_v47, 0.0 }
 0x115   : > { %552 = vadd.xlane.f32.xlu0 %v551_v48 }
 0x19e   : > { %v550_v50 = vpop.xlane.xlu0 %549 }
 0x19f   : > { %v561_v53 = vrot.slane %v550_v50, %v560_v51 }
 0x1a2   : > { %v553_v52 = vpop.xlane.xlu0 %552 }
 0x1a3   : > { %v565_v54 = vrot.slane %v553_v52, %v560_v51 }
 0x1a5   : > { %v567_v55 = vsel %vm566_vm4, %v565_v54, %v561_v53 }
 0x1a6   : > { %v570_v56 = vsel %vm569_vm5, %v567_v55, -inf }
 0x1a7   : > { %571 = vmax.xlane.f32.xlu1 %v570_v56 }
 0x234   : > { %v572_v59 = vpop.xlane.xlu1 %571 }
 0x235   : > { %v577_v60 = vrot.slane %v572_v59, %v538_v37  ;;  %v581_v61 = vrot.slane %v572_v59, %v580_v58 }
 0x237   : > { %v584_v62 = vsub.f32 %v550_v50, %v577_v60  ;;  %v585_v63 = vsub.f32 %v553_v52, %v581_v61 }
 0x239   : > { %v586_v0 = vmul.f32 1.442695, %v584_v62  ;;  %v588_v1 = vmul.f32 1.442695, %v585_v63 }
 0x23b   : > { %926 = vpow2.f32 %v586_v0 }
 0x23c   : > { %928 = vpow2.f32 %v588_v1 }
 0x245   : > { %v927_v2 = vpop.eup %926 }
 0x246   : > { %v929_v3 = vpop.eup %928  ;;  %593 = vperm.xlu1 %924, %v927_v2  }
 0x247   : > { %596 = vperm.xlu0 %925, %v929_v3  }
 0x2c5   : > { %v594_v4 = vpop.permute.xlu1 %593 }
 0x2c6   : > { %v597_v5 = vpop.permute.xlu0 %596  ;;  %v601_v6 = vrot.slane %v594_v4, %v560_v51  ;;  %v613_v11 = vmul.f32 %v594_v4, %v341_v40 }
 0x2c7   : > { %v605_v7 = vrot.slane %v597_v5, %v560_v51  ;;  %v614_v10 = vmul.f32 %v597_v5, %v342_v43 }
 0x2c8   : > { %v615_v13 = vsel %vm357_vm2, %v613_v11, 0.0 }
 0x2c9   : > { %v606_v8 = vsel %vm566_vm4, %v605_v7, %v601_v6  ;;  %v622_v12 = vsel %vm357_vm2, %v614_v10, 0.0  ;;  %v616_v15 = vrot.slane %v615_v13, 4 }
 0x2ca   : > { %v608_v9 = vsel %vm569_vm5, %v606_v8, 0.0  ;;  %v623_v14 = vrot.slane %v622_v12, 4 }
 0x2cb   : > { %609 = vadd.xlane.f32.xlu1 %v608_v9  ;;  %v617_v17 = vadd.f32 %v616_v15, %v615_v13 }
 0x2cc   : > { %v624_v16 = vadd.f32 %v623_v14, %v622_v12 }
 0x2cd   : > { %v618_v21 = vrot.slane %v617_v17, 2 }
 0x2ce   : > { %v625_v18 = vrot.slane %v624_v16, 2 }
 0x2cf   : > { %v619_v23 = vadd.f32 %v618_v21, %v617_v17 }
 0x2d0   : > { %v626_v22 = vadd.f32 %v625_v18, %v624_v16 }
 0x2d1   : > { %v620_v25 = vrot.slane %v619_v23, 1 }
 0x2d2   : > { %v627_v24 = vrot.slane %v626_v22, 1 }
 0x2d3   : > { %v621_v29 = vadd.f32 %v620_v25, %v619_v23 }
 0x2d4   : > { %v628_v27 = vadd.f32 %v627_v24, %v626_v22 }
 0x358   : > { %v610_v19 = vpop.xlane.xlu1 %609 }
 0x359   : > { %v630_v20 = vrot.slane %v610_v19, 1  ;;  %930 = vrcp.f32 %v610_v19 }
 0x35b   : > { %932 = vrcp.f32 %v630_v20 }
 0x363   : > { %v931_v26 = vpop.eup %930 }
 0x364   : > { %v634_v31 = vmul.f32 %v931_v26, %v621_v29 }
 0x365   : > { %v933_v28 = vpop.eup %932 }
 0x366   : > { %v636_v30 = vmul.f32 %v933_v28, %v628_v27 }
 0x368   : > { %v639_v32 = vrot.slane %v636_v30, 7 }
 0x36a   : > { %v640_v33 = vsel %vm566_vm4, %v639_v32, %v634_v31 }
 0x36b   : > { %643 = vst.msk [vmem:[#allocation2] sm:$0x3] %vm642_vm6, %v640_v33  ;;  %644 = vst.msk [vmem:[%s311_s27] sm:$0x3] %vm642_vm6, %v640_v33 }
 0x36c   : > { %947 = shalt.err (!%p944_p6)
}
 0x36d   : > { %s948_s11 = scalar_lea.hbm %s1183_s14, 32  ;;  %s952_s19 = scalar_lea.hbm %s1241_s6, 128 }
 0x36e   : > { %p949_p7 = scmp.ne.s32.totalorder %s1183_s14, %s948_s11  ;;  %p953_p11 = scmp.lt.u32.totalorder %s1183_s14, %s1241_s6 }
 0x36f   : > { %p954_p12 = scmp.lt.u32.totalorder %s952_s19, %s948_s11  ;;  %p956_p0 = scmp.lt.u32.totalorder %s948_s11, %s1183_s14 }
 0x370   : > { %p950_p9 = pnand %p949_p7, %p1095_p4 }
 0x371   : > { %p955_p13 = por %p954_p12, %p953_p11 }
 0x372   : > { %p951_p10 = pneg %p950_p9 }
 0x373   : > { %p957_p1 = por %p956_p0, %p955_p13 }
 0x375   : > { %p958_p2 = pnand %p957_p1, %p951_p10 }
 0x377   : > { %961 = shalt.err (!%p958_p2)
}
 0x378   : > { %864 = dma.vmem_to_hbm [thread:$0]  (%p1095_p4), %s1185_s17, 32, %s1183_s14, %s646_s24  }
 0x379 PF: > { %p870_p3 = scmp.ge.s32.totalorder %s1012_s26, 2  ;;  %s672_s30 = sand.u32 1, %s992_s21  }
 0x37a   : > { %s673_s8 = scalar_lea.sflag [#allocation4], %s672_s30 }
 0x37b   : > { %p867_p5 = pnand %p870_p3, %p1102_p8 }
 0x37d   : > { %987 = dma.done.wait (!%p867_p5), %s673_s8, 32  }
 0x37e   : > { %989 = vsyncadd (!%p867_p5), %s673_s8, 4294967264  ;;  %s19_s26 = sadd.s32 1, %s1012_s26   ;;  %s1244_s21 = smov %s996_s22 }
 0x37f   : > { %p16_p6 = scmp.ge.s32.totalorder %s19_s26, 6   ;;  %s1245_s22 = smov %s1000_s23 }
 0x380   : > { %s1246_s23 = smov %s1108_s10  ;;  %s1247_s24 = smov %s1008_s25 }
 0x381   : > { %s1248_s25 = smov %s1250_s29  ;;  %18 = sbr.rel (!%p16_p6) target bundleno = 4 (0x4), region = 95 }
 0x388   :  { %678 = vsyncpa [#allocation4], 1 }
 0x389   :  { %680 = vsyncpa [#allocation4 + $0x1], 1 }

</bundles_post_ra>
